<compile_context>
chip_gen: v5e
topology: v5e:2x2
jax: 0.10.0
libtpu: 0.0.40
codegen_flags: <defaults>
</compile_context>

<pallas_src>
import functools

import jax
import jax.numpy as jnp
from jax.experimental import pallas as pl
from jax.experimental.pallas import tpu as pltpu


def _round_up(v, m):
    return ((v + m - 1) // m) * m


def _ffn_kernel(x_ref, w1_ref, w2_ref, o_ref, *, i_pad, beta):
    """Fused fc1 + SwiGLU gate + fc2 for one block of rows.

    x_ref : (tm, E)
    w1_ref: (E, 2*I_pad)  columns [0:I_pad] -> x1 branch, [I_pad:2*I_pad] -> gate
    w2_ref: (I_pad, E)
    o_ref : (tm, E)
    """
    x = x_ref[...]
    # Single wide fc1 matmul covering both chunks (one MXU push stream).
    h = jnp.dot(x, w1_ref[...], preferred_element_type=jnp.float32)     # (tm, 2*I_pad)
    # 128-lane-aligned split (I_pad is a multiple of 128): free slicing.
    x1 = h[:, :i_pad]
    x2 = h[:, i_pad:]
    # SwiGLU gate in f32 (v5e has no bf16 VPU/EUP); logistic goes to the EUP.
    gated = x1 * (x2 * jax.nn.sigmoid(beta * x2))                       # (tm, I_pad)
    o_ref[...] = jnp.dot(
        gated, w2_ref[...], preferred_element_type=jnp.float32
    ).astype(o_ref.dtype)


def feed_forward(x, params, *, beta, block_m=256):
    """x: (B, S, E) float32 -> (B, S, E).  Weights stored as (in, out)."""
    B, S, E = x.shape
    w1 = params["w1"]            # (E, 2*I)
    w2 = params["w2"]            # (I, E)
    inter = w2.shape[0]
    assert w1.shape == (E, 2 * inter)

    # ---- pad intermediate dim to a 128-lane boundary so the chunk split is
    # ---- vreg-tile aligned inside the kernel (no-op when I % 128 == 0).
    i_pad = _round_up(inter, 128)
    if i_pad != inter:
        w1p = jnp.zeros((E, 2 * i_pad), w1.dtype)
        w1p = w1p.at[:, :inter].set(w1[:, :inter])               # x1 branch
        w1p = w1p.at[:, i_pad:i_pad + inter].set(w1[:, inter:])  # gate branch
        w2p = jnp.zeros((i_pad, E), w2.dtype).at[:inter, :].set(w2)
    else:
        w1p, w2p = w1, w2

    # ---- flatten rows and pick a big MXU-friendly row tile.
    M = B * S
    bm = min(block_m, _round_up(M, 8))          # tile rows, multiple of 8
    m_pad = _round_up(M, bm)
    xm = x.reshape(M, E)
    if m_pad != M:
        xm = jnp.pad(xm, ((0, m_pad - M), (0, 0)))   # zero rows -> zero output rows
    grid = (m_pad // bm,)

    # ---- VMEM budget: double-buffered x/out blocks + both weight slabs (x2 for
    # ---- the default double buffering), with headroom; capped for v7x (64 MiB).
    itemsize = 4
    need = itemsize * (2 * bm * E            # x blocks
                       + 2 * bm * E          # out blocks
                       + 2 * E * 2 * i_pad   # w1 (resident, default 2 buffers)
                       + 2 * i_pad * E)      # w2
    vmem_limit = int(min(max(need + (4 << 20), 16 << 20), 48 << 20))

    cost = pl.CostEstimate(
        flops=2 * m_pad * E * (2 * i_pad) + 2 * m_pad * i_pad * E,
        transcendentals=m_pad * i_pad,
        bytes_accessed=itemsize * (m_pad * E * 2 + E * 2 * i_pad + i_pad * E),
    )

    out = pl.pallas_call(
        functools.partial(_ffn_kernel, i_pad=i_pad, beta=beta),
        out_shape=jax.ShapeDtypeStruct((m_pad, E), x.dtype),
        grid_spec=pltpu.PrefetchScalarGridSpec(
            num_scalar_prefetch=0,
            grid=grid,
            in_specs=[
                pl.BlockSpec((bm, E), lambda i: (i, 0)),
                pl.BlockSpec((E, 2 * i_pad), lambda i: (0, 0)),   # resident weights
                pl.BlockSpec((i_pad, E), lambda i: (0, 0)),       # resident weights
            ],
            out_specs=pl.BlockSpec((bm, E), lambda i: (i, 0)),
        ),
        compiler_params=pltpu.CompilerParams(
            dimension_semantics=("parallel",),
            vmem_limit_bytes=vmem_limit,
        ),
        cost_estimate=cost,
    )(xm, w1p, w2p)

    return out[:M].reshape(B, S, E)


def reference_forward(x, params, *, beta):
    """Plain-JAX reference reproducing the torch FeedForward (bias=False)."""
    hp = jax.lax.Precision.HIGHEST
    inter = params["w2"].shape[0]
    h = jnp.matmul(x, params["w1"], precision=hp)
    x1 = h[..., :inter]
    x2 = h[..., inter:]
    sig = 1.0 / (1.0 + jnp.exp(-beta * x2))
    return jnp.matmul(x1 * (x2 * sig), params["w2"], precision=hp)


if __name__ == "__main__":
    # ModelConfig: embedding_size=32, intermediate_dim=64, swiglu_beta=1.0, bias=False
    E = 32
    INTER = 64
    BETA = 1.0
    B, S = 2, 8

    key = jax.random.PRNGKey(0)
    kx, k1, k2 = jax.random.split(key, 3)

    x = jax.random.normal(kx, (B, S, E), dtype=jnp.float32)
    params = {
        # stored as (in, out); torch nn.Linear stores (out, in) and applies x @ W.T
        "w1": 0.05 * jax.random.normal(k1, (E, 2 * INTER), dtype=jnp.float32),
        "w2": 0.05 * jax.random.normal(k2, (INTER, E), dtype=jnp.float32),
    }

    out = jax.block_until_ready(feed_forward(x, params, beta=BETA))
    ref = jax.block_until_ready(reference_forward(x, params, beta=BETA))

    assert out.shape == (B, S, E), out.shape
    assert jnp.allclose(out, ref, atol=1e-5, rtol=1e-5), "mismatch vs reference"
    print("KERNEL_OK")
</pallas_src>

<mosaic_0001>
module attributes {stable_mosaic.version = 11 : i64} {
  func.func @_ffn_kernel(%arg0: i32, %arg1: memref<16x32xf32, #tpu.memory_space<vmem>>, %arg2: memref<32x256xf32, #tpu.memory_space<vmem>>, %arg3: memref<128x32xf32, #tpu.memory_space<vmem>>, %arg4: memref<16x32xf32, #tpu.memory_space<vmem>>) attributes {dimension_semantics = [#tpu.dimension_semantics<parallel>], iteration_bounds = array<i64: 1>, scalar_prefetch = 0 : i64, scratch_operands = 0 : i64, tpu.core_type = #tpu.core_type<tc>, window_params = [{transform_indices = @transform_0, window_bounds = array<i64: 16, 32>}, {pipeline_mode = #tpu.pipeline_mode<synchronous>, transform_indices = @transform_1, window_bounds = array<i64: 32, 256>}, {pipeline_mode = #tpu.pipeline_mode<synchronous>, transform_indices = @transform_2, window_bounds = array<i64: 128, 32>}, {transform_indices = @transform_3, window_bounds = array<i64: 16, 32>}]} {
    %c0 = arith.constant 0 : index
    %c0_0 = arith.constant 0 : index
    %0 = vector.load %arg1[%c0, %c0_0] : memref<16x32xf32, #tpu.memory_space<vmem>>, vector<16x32xf32>
    %c0_1 = arith.constant 0 : index
    %c0_2 = arith.constant 0 : index
    %1 = vector.load %arg2[%c0_1, %c0_2] : memref<32x256xf32, #tpu.memory_space<vmem>>, vector<32x256xf32>
    %cst = arith.constant dense<0.000000e+00> : vector<16x256xf32>
    %2 = tpu.matmul %0, %1, %cst {dimension_numbers = #tpu.dot_dimension_numbers<[1], [0], [0], [1], [0, 0, 1, 1], [], []>} : vector<16x32xf32>, vector<32x256xf32>, vector<16x256xf32> -> vector<16x256xf32>
    %3 = vector.extract_strided_slice %2 {offsets = [0, 0], sizes = [16, 128], strides = [1, 1]} : vector<16x256xf32> to vector<16x128xf32>
    %4 = vector.extract_strided_slice %2 {offsets = [0, 128], sizes = [16, 128], strides = [1, 1]} : vector<16x256xf32> to vector<16x128xf32>
    %cst_3 = arith.constant 1.000000e+00 : f32
    %5 = vector.broadcast %cst_3 : f32 to vector<16x128xf32>
    %6 = arith.mulf %5, %4 : vector<16x128xf32>
    %7 = arith.negf %6 : vector<16x128xf32>
    %8 = math.exp %7 : vector<16x128xf32>
    %cst_4 = arith.constant 1.000000e+00 : f32
    %9 = vector.broadcast %cst_4 : f32 to vector<16x128xf32>
    %10 = arith.addf %9, %8 : vector<16x128xf32>
    %11 = arith.divf %9, %10 : vector<16x128xf32>
    %12 = arith.mulf %4, %11 : vector<16x128xf32>
    %13 = arith.mulf %3, %12 : vector<16x128xf32>
    %c0_5 = arith.constant 0 : index
    %c0_6 = arith.constant 0 : index
    %14 = vector.load %arg3[%c0_5, %c0_6] : memref<128x32xf32, #tpu.memory_space<vmem>>, vector<128x32xf32>
    %cst_7 = arith.constant dense<0.000000e+00> : vector<16x32xf32>
    %15 = tpu.matmul %13, %14, %cst_7 {dimension_numbers = #tpu.dot_dimension_numbers<[1], [0], [0], [1], [0, 0, 1, 1], [], []>} : vector<16x128xf32>, vector<128x32xf32>, vector<16x32xf32> -> vector<16x32xf32>
    %c0_8 = arith.constant 0 : index
    %c0_9 = arith.constant 0 : index
    %16 = vector.load %arg4[%c0_8, %c0_9] : memref<16x32xf32, #tpu.memory_space<vmem>>, vector<16x32xf32>
    tpu.vector_store %arg4[%c0_8, %c0_9], %15 {strides = array<i32>} : memref<16x32xf32, #tpu.memory_space<vmem>>, vector<16x32xf32>,
    return
  }
  func.func @transform_0(%arg0: i32) -> (i32, i32) {
    %c0_i32 = arith.constant 0 : i32
    %c0_i32_0 = arith.constant 0 : i32
    return %arg0, %c0_i32 : i32, i32
  }
  func.func @transform_1(%arg0: i32) -> (i32, i32) {
    %c0_i32 = arith.constant 0 : i32
    %c0_i32_0 = arith.constant 0 : i32
    %c0_i32_1 = arith.constant 0 : i32
    return %c0_i32, %c0_i32_0 : i32, i32
  }
  func.func @transform_2(%arg0: i32) -> (i32, i32) {
    %c0_i32 = arith.constant 0 : i32
    %c0_i32_0 = arith.constant 0 : i32
    %c0_i32_1 = arith.constant 0 : i32
    return %c0_i32, %c0_i32_0 : i32, i32
  }
  func.func @transform_3(%arg0: i32) -> (i32, i32) {
    %c0_i32 = arith.constant 0 : i32
    %c0_i32_0 = arith.constant 0 : i32
    return %arg0, %c0_i32 : i32, i32
  }
}

</mosaic_0001>

<bundles_post_ra>
// kernel: tpu_custom_call.1
= control target key start
LH: loop header
LB: loop body
LE: loop exit
PB: predicated region body
PF: predicated region fallthrough
CT: control target
= control target key end

     0   :  { %s348_s0 = inlined_call_operand.vmem [shape: f32[16,32], index: 0, kind: input, shape index: {}]   ;;  %s349_s1 = inlined_call_operand.vmem [shape: f32[32,256], index: 1, kind: input, shape index: {}]   ;;  %s350_s2 = inlined_call_operand.vmem [shape: f32[128,32], index: 2, kind: input, shape index: {}]   ;;  %s351_s3 = inlined_call_operand.hbm [shape: f32[16,32], index: 3, kind: output, shape index: {}]  }
   0x1   :  { %v24_v0 = vld [vmem:[%s349_s1 + $0x38] sm:$0xff]  ;;  %v22_v1 = vld [vmem:[%s349_s1 + $0x28] sm:$0xff]  ;;  %v23_v3 = vld [vmem:[%s349_s1 + $0x30] sm:$0xff] }
   0x2   :  { %67 = vmatpush.msra.mxu1 %v24_v0  ;;  %v20_v2 = vld [vmem:[%s349_s1 + $0x18] sm:$0xff]  ;;  %v21_v4 = vld [vmem:[%s349_s1 + $0x20] sm:$0xff]  ;;  %44 = vmatpush.msra.mxu0 %v23_v3 }
   0x4   :  { %68 = vmatpush.msra.mxu1 %v22_v1 }
   0x5   :  { %8 = vsyncpa [#allocation3], 0  ;;  %v18_v5 = vld [vmem:[%s349_s1 + $0x8] sm:$0xff]  ;;  %v19_v6 = vld [vmem:[%s349_s1 + $0x10] sm:$0xff]  ;;  %vm25_vm0 = vcmask 261120   ;;  %45 = vmatpush.msra.mxu0 %v21_v4  ;;  %s239_s10 = smov 128  }
   0x6   :  { %69 = vmatpush.msra.mxu1 %v20_v2  ;;  %v15_v7 = vld [vmem:[%s348_s0] sm:$0xff]  ;;  %v16_v9 = vld [vmem:[%s348_s0 + $0x8] sm:$0xff]  ;;  %v135_v10 = vld [vmem:[%s350_s2 + $0x78] sm:$0xff]  ;;  %s167_s0 = sshll.u32 %s351_s3, 4  ;;  %s240_s11 = smov 8   ;;  %s168_s0 = int_to_ptr.hbm [resolvable:$true] %s167_s0 }
   0x7   :  { %v17_v8 = vld [vmem:[%s349_s1] sm:$0xff]  ;;  %46 = vmatpush.msra.mxu0 %v19_v6  ;;  %136 = vmatpush.msra.mxu2 %v135_v10  ;;  %v134_v11 = vld [vmem:[%s350_s2 + $0x70] sm:$0xff]  ;;  %v133_v12 = vld [vmem:[%s350_s2 + $0x68] sm:$0xff] }
   0x8   :  { %70 = vmatpush.msra.mxu1 %v18_v5  ;;  %185 = vmatpush.msra.mxu3 %v135_v10  ;;  %v132_v13 = vld [vmem:[%s350_s2 + $0x60] sm:$0xff]  ;;  %v131_v14 = vld [vmem:[%s350_s2 + $0x58] sm:$0xff]  ;;  %v130_v15 = vld [vmem:[%s350_s2 + $0x50] sm:$0xff] }
   0x9   :  { %181 = vmatmul.msk.f32.vlgmr.msra.gmra.mxu1 %vm25_vm0, %v15_v7  ;;  %47 = vmatpush.msra.mxu0 %v17_v8  ;;  %v129_v16 = vld [vmem:[%s350_s2 + $0x48] sm:$0xff]  ;;  %v128_v17 = vld [vmem:[%s350_s2 + $0x40] sm:$0xff]  ;;  %v127_v18 = vld [vmem:[%s350_s2 + $0x38] sm:$0xff] }
   0xa   :  { %179 = vmatmul.msk.f32.vlgmr.msra.gmra.mxu0 %vm25_vm0, %v15_v7  ;;  %137 = vmatpush.msra.mxu2 %v134_v11  ;;  %v126_v19 = vld [vmem:[%s350_s2 + $0x30] sm:$0xff]  ;;  %v125_v20 = vld [vmem:[%s350_s2 + $0x28] sm:$0xff]  ;;  %v124_v21 = vld [vmem:[%s350_s2 + $0x20] sm:$0xff] }
   0xb   :  { %186 = vmatpush.msra.mxu3 %v134_v11  ;;  %v123_v22 = vld [vmem:[%s350_s2 + $0x18] sm:$0xff]  ;;  %v122_v23 = vld [vmem:[%s350_s2 + $0x10] sm:$0xff]  ;;  %v121_v24 = vld [vmem:[%s350_s2 + $0x8] sm:$0xff] }
   0xc   :  { %138 = vmatpush.msra.mxu2 %v133_v12  ;;  %v120_v25 = vld [vmem:[%s350_s2] sm:$0xff]  ;;  %s238_s2 = smov [#allocation2]  }
   0xd   :  { %187 = vmatpush.msra.mxu3 %v133_v12  ;;  %s165_s7 = sshll.u32 %s238_s2, 4  ;;  %s166_s7 = int_to_ptr.vmem [resolvable:$true] %s165_s7 }
   0xe   :  { %139 = vmatpush.msra.mxu2 %v132_v13 }
   0xf   :  { %188 = vmatpush.msra.mxu3 %v132_v13 }
  0x10   :  { %140 = vmatpush.msra.mxu2 %v131_v14 }
  0x11   :  { %182 = vmatmul.msk.f32.gmra.mxu1 %vm25_vm0, %v16_v9  ;;  %189 = vmatpush.msra.mxu3 %v131_v14 }
  0x12   :  { %180 = vmatmul.msk.f32.gmra.mxu0 %vm25_vm0, %v16_v9  ;;  %141 = vmatpush.msra.mxu2 %v130_v15 }
  0x13   :  { %190 = vmatpush.msra.mxu3 %v130_v15 }
  0x14   :  { %142 = vmatpush.msra.mxu2 %v129_v16 }
  0x15   :  { %191 = vmatpush.msra.mxu3 %v129_v16 }
  0x16   :  { %143 = vmatpush.msra.mxu2 %v128_v17 }
  0x17   :  { %192 = vmatpush.msra.mxu3 %v128_v17 }
  0x18   :  { %144 = vmatpush.msra.mxu2 %v127_v18 }
  0x19   :  { %193 = vmatpush.msra.mxu3 %v127_v18 }
  0x1a   :  { %145 = vmatpush.msra.mxu2 %v126_v19 }
  0x1b   :  { %194 = vmatpush.msra.mxu3 %v126_v19 }
  0x1c   :  { %146 = vmatpush.msra.mxu2 %v125_v20 }
  0x1d   :  { %195 = vmatpush.msra.mxu3 %v125_v20 }
  0x1e   :  { %147 = vmatpush.msra.mxu2 %v124_v21 }
  0x1f   :  { %196 = vmatpush.msra.mxu3 %v124_v21 }
  0x20   :  { %148 = vmatpush.msra.mxu2 %v123_v22 }
  0x21   :  { %197 = vmatpush.msra.mxu3 %v123_v22 }
  0x22   :  { %149 = vmatpush.msra.mxu2 %v122_v23 }
  0x23   :  { %198 = vmatpush.msra.mxu3 %v122_v23 }
  0x24   :  { %150 = vmatpush.msra.mxu2 %v121_v24 }
  0x25   :  { %199 = vmatpush.msra.mxu3 %v121_v24 }
  0x26   :  { %151 = vmatpush.msra.mxu2 %v120_v25 }
  0x27   :  { %200 = vmatpush.msra.mxu3 %v120_v25 }
  0x86   :  { %v72_v26 = vpop.f32.mrf.mxu1 }
  0x87   :  { %v183_v27 = vmul.f32 -1.442695, %v72_v26  ;;  %v49_v43 = vpop.f32.mrf.mxu0 }
  0x89   :  { %204 = vpow2.f32 %v183_v27 }
  0x8e   :  { %v75_v28 = vpop.f32.mrf.mxu1 }
  0x8f   :  { %v205_v29 = vpop.eup %204  ;;  %v184_v30 = vmul.f32 -1.442695, %v75_v28  ;;  %v52_v57 = vpop.f32.mrf.mxu0 }
  0x90   :  { %v84_v31 = vadd.f32 1.0, %v205_v29 }
  0x91   :  { %206 = vpow2.f32 %v184_v30 }
  0x92   :  { %208 = vrcp.f32 %v84_v31  ;;  %v97_v37 = vand.u32 2147483648, %v84_v31  ;;  %v95_v39 = vand.u32 2147483647, %v84_v31  ;;  %vm91_vm2 = vweird.f32 %v84_v31 }
  0x94   :  { %v98_v42 = vor.u32 1.1754944e-38, %v97_v37  ;;  %vm96_vm4 = vcmp.eq.f32.partialorder %v95_v39, 8.507059e+37 }
  0x97   :  { %v207_v32 = vpop.eup %206 }
  0x98   :  { %v209_v33 = vpop.eup %208  ;;  %v85_v34 = vadd.f32 1.0, %v207_v32 }
  0x99   :  { %v87_v35 = vmul.f32 %v209_v33, %v84_v31  ;;  %vm92_vm1 = vweird.f32 %v209_v33 }
  0x9a   :  { %210 = vrcp.f32 %v85_v34  ;;  %vm93_vm3 = vmor %vm91_vm2, %vm92_vm1  ;;  %v112_v49 = vand.u32 2147483648, %v85_v34  ;;  %v110_v51 = vand.u32 2147483647, %v85_v34  ;;  %vm106_vm6 = vweird.f32 %v85_v34 }
  0x9b   :  { %v88_v36 = vsub.f32 1.0, %v87_v35 }
  0x9c   :  { %v113_v54 = vor.u32 1.1754944e-38, %v112_v49  ;;  %vm111_vm8 = vcmp.eq.f32.partialorder %v110_v51, 8.507059e+37 }
  0x9d   :  { %v89_v38 = vmul.f32 %v209_v33, %v88_v36 }
  0x9f   :  { %v90_v40 = vadd.f32 %v209_v33, %v89_v38 }
  0xa0   :  { %v211_v41 = vpop.eup %210 }
  0xa1   :  { %v94_v44 = vsel %vm93_vm3, %v209_v33, %v90_v40  ;;  %v102_v45 = vmul.f32 %v211_v41, %v85_v34  ;;  %vm107_vm5 = vweird.f32 %v211_v41 }
  0xa2   :  { %v99_v46 = vsel %vm96_vm4, %v98_v42, %v94_v44  ;;  %vm108_vm7 = vmor %vm106_vm6, %vm107_vm5 }
  0xa3   :  { %v116_v47 = vmul.f32 %v99_v46, %v72_v26  ;;  %v103_v48 = vsub.f32 1.0, %v102_v45 }
  0xa5   :  { %v104_v50 = vmul.f32 %v211_v41, %v103_v48  ;;  %v118_v52 = vmul.f32 %v116_v47, %v49_v43 }
  0xa7   :  { %v105_v53 = vadd.f32 %v211_v41, %v104_v50  ;;  %152 = vmatmul.f32.vlgmr.msra.gmra.mxu2 %v118_v52 }
  0xa9   :  { %v109_v55 = vsel %vm108_vm7, %v211_v41, %v105_v53 }
  0xaa   :  { %v114_v56 = vsel %vm111_vm8, %v113_v54, %v109_v55 }
  0xab   :  { %v117_v58 = vmul.f32 %v114_v56, %v75_v28 }
  0xad   :  { %v119_v59 = vmul.f32 %v117_v58, %v52_v57 }
  0xaf   :  { %155 = vmatmul.f32.vlgmr.msra.gmra.mxu3 %v119_v59 }
 0x12a   :  { %v153_v60 = vpop.f32.mrf.mxu2 }
 0x12b   :  { %159 = vst.msk [vmem:[#allocation2] sm:$0xff] %vm25_vm0, %v153_v60 }
 0x132   :  { %v156_v61 = vpop.f32.mrf.mxu3 }
 0x133   :  { %160 = vst.msk [vmem:[#allocation2 + $0x8] sm:$0xff] %vm25_vm0, %v156_v61 }
 0x134   :  { %173 = dma.vmem_to_hbm [thread:$0]  %s166_s7, 256, %s168_s0, [#allocation3], %s239_s10, %s239_s10, %s240_s11  }
 0x135   :  { %236 = dma.done.wait [#allocation3], 256  }
 0x136   :  { %237 = vsyncadd [#allocation3], 4294967040 }
 0x137   :  { %178 = vsyncpa [#allocation3], 1 }

</bundles_post_ra>
